<compile_context>
chip_gen: v7x
topology: tpu7x:2x2x1
jax: 0.10.0
libtpu: 0.0.40
codegen_flags: <defaults>
</compile_context>

<pallas_src>
import functools
import math

import jax
import jax.numpy as jnp
import numpy as np
from jax.experimental import pallas as pl
from jax.experimental.pallas import tpu as pltpu


def _mean_std_kernel(x_ref, mean_ref, inv_std_ref, o_ref, *, clip):
    x = x_ref[...]                       # (tile_r, tile_f)
    out = (x - mean_ref[...]) * inv_std_ref[...]   # mean/inv_std broadcast over rows
    if clip is not None:
        out = jnp.clip(out, -clip, clip)
    o_ref[...] = out.astype(o_ref.dtype)


def mean_std_normalize(val, mean, std, clip=None):
    """Pallas forward of MeanStd: ((val - mean) / std) optionally clipped.

    val:  (B, F) float32
    mean: (F,)   float32
    std:  (F,)   float32
    clip: optional python float (static)
    """
    B, F = val.shape
    val = val.astype(jnp.float32)
    mean = mean.astype(jnp.float32)
    # Exact f32 divide done once per feature in XLA; kernel only multiplies.
    inv_std = 1.0 / std.astype(jnp.float32)

    # ---- lane-dense layout: fold g batch rows into the lane dim if F < 128 ----
    if F % 128 == 0 or F >= 128:
        g = 1
    else:
        g = 128 // math.gcd(F, 128)      # smallest g with (g*F) % 128 == 0
    G = g * F

    # ---- feature tile: multiple of 128 when possible, otherwise full dim ----
    if G % 128 == 0:
        if G <= 4096:
            tile_f = G
        else:
            tile_f = 128
            for cand in range(4096, 127, -128):
                if G % cand == 0:
                    tile_f = cand
                    break
    else:
        tile_f = G                       # full last dim (legal; masked stores)

    # ---- batch-row tile: target ~2 MiB f32 per val block ----
    rows = -(-B // g)                    # cdiv(B, g)
    target_rows = max(8, (2 * 1024 * 1024) // (tile_f * 4))
    target_rows = max(8, (target_rows // 8) * 8)
    if rows <= target_rows:
        tile_r = rows                    # block == full dim, always legal
        rows_pad = rows
    else:
        tile_r = target_rows
        rows_pad = -(-rows // tile_r) * tile_r

    B_pad = rows_pad * g
    if B_pad != B:
        val = jnp.pad(val, ((0, B_pad - B), (0, 0)))

    x2 = val.reshape(rows_pad, G)                        # lane-dense view
    mean2 = jnp.tile(mean.reshape(1, F), (1, g))         # (1, G)
    inv2 = jnp.tile(inv_std.reshape(1, F), (1, g))       # (1, G)

    kernel = functools.partial(_mean_std_kernel, clip=clip)

    out2 = pl.pallas_call(
        kernel,
        out_shape=jax.ShapeDtypeStruct((rows_pad, G), jnp.float32),
        grid_spec=pltpu.PrefetchScalarGridSpec(
            num_scalar_prefetch=0,
            grid=(rows_pad // tile_r, G // tile_f),
            in_specs=[
                pl.BlockSpec((tile_r, tile_f), lambda i, j: (i, j)),   # val tile
                pl.BlockSpec((1, tile_f), lambda i, j: (0, j)),        # mean (per-column, fetched once per j)
                pl.BlockSpec((1, tile_f), lambda i, j: (0, j)),        # inv_std
            ],
            out_specs=pl.BlockSpec((tile_r, tile_f), lambda i, j: (i, j)),
        ),
        compiler_params=pltpu.CompilerParams(
            dimension_semantics=("parallel", "parallel"),
        ),
    )(x2, mean2, inv2)

    return out2.reshape(B_pad, F)[:B]


if __name__ == "__main__":
    key = jax.random.PRNGKey(0)

    # Case 1: small RL-style shapes, with clipping (mirrors MeanStd(shape=(F,))).
    B, F = 8, 32
    clip = 5.0
    kx, km, ks, key = jax.random.split(key, 4)
    x = jax.random.normal(kx, (B, F), dtype=jnp.float32) * 3.0
    mean_param = jax.random.normal(km, (F,), dtype=jnp.float32) * 0.5
    std_param = jnp.abs(jax.random.normal(ks, (F,), dtype=jnp.float32)) + 0.5

    out = jax.block_until_ready(mean_std_normalize(x, mean_param, std_param, clip=clip))
    ref = jnp.clip((x - mean_param[None, :]) / std_param[None, :], -clip, clip)
    np.testing.assert_allclose(np.asarray(out), np.asarray(ref), rtol=1e-5, atol=1e-6)

    # Case 2: batch not divisible by the fold/tile factors, no clipping.
    B2, F2 = 37, 96
    kx2, km2, ks2, key = jax.random.split(key, 4)
    x2 = jax.random.normal(kx2, (B2, F2), dtype=jnp.float32) * 2.0
    mean2 = jax.random.normal(km2, (F2,), dtype=jnp.float32)
    std2 = jnp.abs(jax.random.normal(ks2, (F2,), dtype=jnp.float32)) + 0.5

    out2 = jax.block_until_ready(mean_std_normalize(x2, mean2, std2, clip=None))
    ref2 = (x2 - mean2[None, :]) / std2[None, :]
    np.testing.assert_allclose(np.asarray(out2), np.asarray(ref2), rtol=1e-5, atol=1e-6)

    print("KERNEL_OK")
</pallas_src>

<mosaic_0001>
module attributes {stable_mosaic.version = 11 : i64} {
  func.func @_mean_std_kernel(%arg0: i32, %arg1: i32, %arg2: memref<2x128xf32, #tpu.memory_space<vmem>>, %arg3: memref<1x128xf32, #tpu.memory_space<vmem>>, %arg4: memref<1x128xf32, #tpu.memory_space<vmem>>, %arg5: memref<2x128xf32, #tpu.memory_space<vmem>>) attributes {dimension_semantics = [#tpu.dimension_semantics<parallel>, #tpu.dimension_semantics<parallel>], iteration_bounds = array<i64: 1, 1>, scalar_prefetch = 0 : i64, scratch_operands = 0 : i64, tpu.core_type = #tpu.core_type<tc>, window_params = [{transform_indices = @transform_0, window_bounds = array<i64: 2, 128>}, {transform_indices = @transform_1, window_bounds = array<i64: 1, 128>}, {transform_indices = @transform_2, window_bounds = array<i64: 1, 128>}, {transform_indices = @transform_3, window_bounds = array<i64: 2, 128>}]} {
    %c0 = arith.constant 0 : index
    %c0_0 = arith.constant 0 : index
    %0 = vector.load %arg2[%c0, %c0_0] : memref<2x128xf32, #tpu.memory_space<vmem>>, vector<2x128xf32>
    %c0_1 = arith.constant 0 : index
    %c0_2 = arith.constant 0 : index
    %1 = vector.load %arg3[%c0_1, %c0_2] : memref<1x128xf32, #tpu.memory_space<vmem>>, vector<1x128xf32>
    %2 = vector.broadcast %1 : vector<1x128xf32> to vector<2x128xf32>
    %3 = arith.subf %0, %2 : vector<2x128xf32>
    %c0_3 = arith.constant 0 : index
    %c0_4 = arith.constant 0 : index
    %4 = vector.load %arg4[%c0_3, %c0_4] : memref<1x128xf32, #tpu.memory_space<vmem>>, vector<1x128xf32>
    %5 = vector.broadcast %4 : vector<1x128xf32> to vector<2x128xf32>
    %6 = arith.mulf %3, %5 : vector<2x128xf32>
    %cst = arith.constant -5.000000e+00 : f32
    %cst_5 = arith.constant 5.000000e+00 : f32
    %7 = vector.broadcast %cst : f32 to vector<2x128xf32>
    %8 = arith.maximumf %7, %6 : vector<2x128xf32>
    %9 = vector.broadcast %cst_5 : f32 to vector<2x128xf32>
    %10 = arith.minimumf %9, %8 : vector<2x128xf32>
    %c0_6 = arith.constant 0 : index
    %c0_7 = arith.constant 0 : index
    %11 = vector.load %arg5[%c0_6, %c0_7] : memref<2x128xf32, #tpu.memory_space<vmem>>, vector<2x128xf32>
    tpu.vector_store %arg5[%c0_6, %c0_7], %10 {strides = array<i32>} : memref<2x128xf32, #tpu.memory_space<vmem>>, vector<2x128xf32>,
    return
  }
  func.func @transform_0(%arg0: i32, %arg1: i32) -> (i32, i32) {
    %c0_i32 = arith.constant 0 : i32
    return %arg0, %arg1 : i32, i32
  }
  func.func @transform_1(%arg0: i32, %arg1: i32) -> (i32, i32) {
    %c0_i32 = arith.constant 0 : i32
    %c0_i32_0 = arith.constant 0 : i32
    return %c0_i32, %arg1 : i32, i32
  }
  func.func @transform_2(%arg0: i32, %arg1: i32) -> (i32, i32) {
    %c0_i32 = arith.constant 0 : i32
    %c0_i32_0 = arith.constant 0 : i32
    return %c0_i32, %arg1 : i32, i32
  }
  func.func @transform_3(%arg0: i32, %arg1: i32) -> (i32, i32) {
    %c0_i32 = arith.constant 0 : i32
    return %arg0, %arg1 : i32, i32
  }
}

</mosaic_0001>

<bundles_post_ra>
// kernel: tpu_custom_call.1
= control target key start
LH: loop header
LB: loop body
LE: loop exit
PB: predicated region body
PF: predicated region fallthrough
CT: control target
= control target key end

     0   :  { %8 = vsyncpa [#allocation3], 0  ;;  %s167_s0 = inlined_call_operand.hbm [shape: f32[2,128], index: 0, kind: input, shape index: {}]   ;;  %s168_s1 = inlined_call_operand.vmem [shape: f32[1,128], index: 1, kind: input, shape index: {}]   ;;  %s169_s2 = inlined_call_operand.vmem [shape: f32[1,128], index: 2, kind: input, shape index: {}]   ;;  %s170_s3 = inlined_call_operand.hbm [shape: f32[2,128], index: 3, kind: output, shape index: {}]  }
   0x1   :  { %9 = vsyncpa [#allocation4], 0  ;;  %s115_s12 = smov [#allocation2]   ;;  %s67_s16 = scalar_lea.hbm %s167_s0, 32 }
   0x2   :  { %s16_s13 = sshll.u32 %s115_s12, 4  ;;  %p68_p0 = scmp.ne.s32.totalorder %s167_s0, %s67_s16  ;;  %s17_s13 = int_to_ptr.vmem [resolvable:$true] %s16_s13 }
   0x3   :  { %p71_p1 = scmp.lt.u32.totalorder %s67_s16, %s167_s0 }
   0x5   :  { %p73_p2 = pnand %p71_p1, %p68_p0 }
   0x7   :  { %76 = shalt.err (!%p73_p2)
}
   0x8   :  { %s77_s21 = scalar_lea.vmem %s17_s13, 32  ;;  %p82_p4 = scmp.lt.s32.totalorder %s17_s13, %s17_s13 }
   0x9   :  { %p78_p3 = scmp.ne.s32.totalorder %s17_s13, %s77_s21  ;;  %p83_p5 = scmp.lt.s32.totalorder %s77_s21, %s77_s21 }
   0xb   :  { %p84_p6 = por %p83_p5, %p82_p4 }
   0xd   :  { %p85_p7 = pnand %p84_p6, %p78_p3 }
   0xf   :  { %88 = shalt.err (!%p85_p7)
}
  0x10   :  { %19 = dma.hbm_to_vmem [thread:$0]  %s167_s0, 32, %s17_s13, [#allocation3]  }
  0x11   :  { %111 = dma.done.wait [#allocation3], 32  }
  0x12   :  { %112 = vsyncadd [#allocation3], 4294967264  ;;  %v27_v0 = vld [vmem:[#allocation2] sm:$0x3]  ;;  %s116_s28 = smov [#allocation5]  }
  0x13   :  { %v62_v1 = vld [vmem:[%s168_s1] ss:$0 sm:$0xff]  ;;  %s53_s29 = sshll.u32 %s116_s28, 4  ;;  %s54_s29 = int_to_ptr.vmem [resolvable:$true] %s53_s29 }
  0x14   :  { %v63_v2 = vld [vmem:[%s169_s2] ss:$0 sm:$0xff]  ;;  %v35_v3 = vsub.f32 %v27_v0, %v62_v1  ;;  %s89_s30 = scalar_lea.vmem %s54_s29, 32  ;;  %p94_p9 = scmp.lt.s32.totalorder %s54_s29, %s54_s29 }
  0x15   :  { %p90_p8 = scmp.ne.s32.totalorder %s54_s29, %s89_s30  ;;  %p95_p10 = scmp.lt.s32.totalorder %s89_s30, %s89_s30 }
  0x16   :  { %v43_v4 = vmul.f32 %v63_v2, %v35_v3 }
  0x17   :  { %p96_p11 = por %p95_p10, %p94_p9 }
  0x18   :  { %v64_v5 = vclamps-f32 %v43_v4, 5.0 }
  0x19   :  { %p97_p12 = pnand %p96_p11, %p90_p8 }
  0x1a   :  { %46 = vst [vmem:[#allocation5] sm:$0x3] %v64_v5 }
  0x1b   :  { %100 = shalt.err (!%p97_p12)
}
  0x1c   :  { %s101_s4 = scalar_lea.hbm %s170_s3, 32 }
  0x1d   :  { %p102_p13 = scmp.ne.s32.totalorder %s170_s3, %s101_s4  ;;  %p105_p0 = scmp.lt.u32.totalorder %s101_s4, %s170_s3 }
  0x1f   :  { %p107_p1 = pnand %p105_p0, %p102_p13 }
  0x21   :  { %110 = shalt.err (!%p107_p1)
}
  0x22   :  { %56 = dma.vmem_to_hbm [thread:$0]  %s54_s29, 32, %s170_s3, [#allocation4]  }
  0x23   :  { %113 = dma.done.wait [#allocation4], 32  }
  0x24   :  { %114 = vsyncadd [#allocation4], 4294967264 }
  0x25   :  { %60 = vsyncpa [#allocation3], 1 }
  0x26   :  { %61 = vsyncpa [#allocation4], 1 }

</bundles_post_ra>
